<compile_context>
chip_gen: v7x
topology: tpu7x:2x2x1
jax: 0.10.0
libtpu: 0.0.40
codegen_flags: <defaults>
</compile_context>

<pallas_src>
import jax
import jax.numpy as jnp
from jax.experimental import pallas as pl
from jax.experimental.pallas import tpu as pltpu


def _round_up(x, m):
    return ((x + m - 1) // m) * m


def compressed_linear_kernel(x_ref, bwt_ref, awt_ref, bias_ref, o_ref):
    # x_ref:    (TM, K)   tile of input rows (streamed over i)
    # bwt_ref:  (K, R)    B weight, pre-transposed (resident)
    # awt_ref:  (R, TN)   A weight tile, pre-transposed (resident / streamed over j)
    # bias_ref: (1, TN)   A bias tile
    # o_ref:    (TM, TN)
    h = jnp.dot(x_ref[...], bwt_ref[...], preferred_element_type=jnp.float32)
    # Keep the f32 accumulation of the first matmul alive through the second
    # dot (the (R, TN) cast is tiny VPU work; a no-op for f32 inputs).
    y = jnp.dot(h, awt_ref[...].astype(jnp.float32),
                preferred_element_type=jnp.float32)
    y = y + bias_ref[...].astype(jnp.float32)
    o_ref[...] = y.astype(o_ref.dtype)


def _chip_info():
    """Returns (physical VMEM bytes per TensorCore, treat-as-two-TC chip?)."""
    vmem = 128 * 1024 * 1024
    try:
        info = pltpu.get_tpu_info()
        v = getattr(info, "vmem_capacity_bytes", None)
        if v:
            vmem = int(v)
    except Exception:
        pass
    # v7x: 64 MiB VMEM per TC, 2 TCs per chip; v5e/v6e: 128 MiB, 1 TC.
    two_cores = vmem <= 64 * 1024 * 1024
    return vmem, two_cores


def _pick_tiles(M, K, R, N_pad, itemsize, sublane):
    vmem, two_cores = _chip_info()
    # Lane-dense N tile, capped so large out_features doesn't shrink tm.
    tn = min(N_pad, 512)
    # Generation-aware streamed-tile budget (~1/4 of physical VMEM), minus the
    # resident weights; it pays for the double-buffered x and y tiles.
    chip_budget = max(8 * 1024 * 1024, min(32 * 1024 * 1024, vmem // 4))
    weight_bytes = (K * R + 2 * (R * tn + tn)) * itemsize
    budget = max(4 * 1024 * 1024, chip_budget - weight_bytes)
    per_row = 2 * (K + tn) * itemsize          # 2 pipeline buffers for x & y tiles
    cand = (budget // max(per_row, 1)) // sublane * sublane
    cand = max(sublane, min(int(cand), 1024))
    tm = M if M <= cand else cand
    # 2-TC chips: make sure the "parallel" M axis has >= 2 blocks.
    if two_cores and M > 2 * sublane:
        tm = min(tm, _round_up(pl.cdiv(M, 2), sublane))
    return tm, tn, two_cores


def prepare_compressed_linear_params(A_w, B_w, A_bias):
    """One-time parameter prep (do at module init, NOT per call):
    transpose both factors and zero-pad out_features to a multiple of 128."""
    N, R = A_w.shape
    R2, K = B_w.shape
    assert R == R2 and A_bias.shape == (N,)
    N_pad = _round_up(N, 128)
    B_wT = jnp.transpose(B_w)            # (K, R)
    A_wT = jnp.transpose(A_w)            # (R, N)
    bias = A_bias
    if N_pad != N:
        A_wT = jnp.pad(A_wT, ((0, 0), (0, N_pad - N)))
        bias = jnp.pad(bias, (0, N_pad - N))
    return B_wT, A_wT, bias.reshape(1, N_pad), N


def compressed_linear_prepared(x, B_wT, A_wT, bias2d, n_out, *, tm=None, tn=None):
    """y = (x @ B_w.T) @ A_w.T + bias, with pre-transposed / pre-padded weights."""
    orig_shape = x.shape
    K = orig_shape[-1]
    x2 = x.reshape(-1, K)
    M = x2.shape[0]

    K2, R = B_wT.shape
    R2, N_pad = A_wT.shape
    assert K == K2 and R == R2 and bias2d.shape == (1, N_pad)
    assert N_pad % 128 == 0 and n_out <= N_pad

    itemsize = jnp.dtype(x.dtype).itemsize
    sublane = {4: 8, 2: 16, 1: 32}.get(itemsize, 8)

    auto_tm, auto_tn, two_cores = _pick_tiles(M, K, R, N_pad, itemsize, sublane)
    if tm is None:
        tm = auto_tm
    if tn is None:
        tn = auto_tn
    assert tm == M or tm % sublane == 0, f"tm={tm} must equal M or be %{sublane}==0"
    assert tn == N_pad or tn % 128 == 0, f"tn={tn} must equal N_pad or be %128==0"

    grid_m = pl.cdiv(M, tm)
    grid_n = pl.cdiv(N_pad, tn)

    # VMEM allowance: double-buffered streamed tiles + weights + headroom,
    # capped well below physical VMEM (v7x has only 64 MiB per TC).
    tile_bytes = 2 * (tm * K + tm * tn) * itemsize
    weight_bytes = 2 * (K * R + R * tn + tn) * itemsize
    vmem_cap = (48 if two_cores else 96) * 1024 * 1024
    vmem_limit = int(min(vmem_cap,
                         max(16 * 1024 * 1024,
                             tile_bytes + weight_bytes + (2 << 20))))

    cost = pl.CostEstimate(
        flops=2 * M * R * (K + n_out),
        transcendentals=0,
        bytes_accessed=itemsize * (M * K + M * n_out + K * R + R * n_out + n_out),
    )

    def build(use_single_buffer):
        def spec(shape, idx, single):
            if single and use_single_buffer:
                return pl.BlockSpec(shape, idx, pipeline_mode=pl.Buffered(1))
            return pl.BlockSpec(shape, idx)

        awt_resident = grid_n == 1   # only single-buffer A^T/bias when resident
        return pl.pallas_call(
            compressed_linear_kernel,
            out_shape=jax.ShapeDtypeStruct((M, N_pad), x.dtype),
            grid_spec=pltpu.PrefetchScalarGridSpec(
                num_scalar_prefetch=0,
                grid=(grid_m, grid_n),
                in_specs=[
                    pl.BlockSpec((tm, K), lambda i, j: (i, 0)),        # streamed x
                    spec((K, R), lambda i, j: (0, 0), True),           # B^T (resident)
                    spec((R, tn), lambda i, j: (0, j), awt_resident),  # A^T
                    spec((1, tn), lambda i, j: (0, j), awt_resident),  # bias
                ],
                out_specs=pl.BlockSpec((tm, tn), lambda i, j: (i, j)),
            ),
            compiler_params=pltpu.CompilerParams(
                dimension_semantics=("parallel", "parallel"),
                vmem_limit_bytes=vmem_limit,
            ),
            cost_estimate=cost,
        )

    try:
        out = build(use_single_buffer=True)(x2, B_wT, A_wT, bias2d)
    except Exception:
        # pipeline_mode=pl.Buffered(1) unsupported on this jax version ->
        # fall back to default double buffering (semantics identical).
        out = build(use_single_buffer=False)(x2, B_wT, A_wT, bias2d)

    if n_out != N_pad:
        out = out[:, :n_out]
    return out.reshape(orig_shape[:-1] + (n_out,))


def compressed_linear(x, B_w, A_w, A_bias, *, tm=None, tn=None):
    """Convenience one-shot wrapper.  For repeated calls, use
    prepare_compressed_linear_params(...) once + compressed_linear_prepared."""
    B_wT, A_wT, bias2d, n_out = prepare_compressed_linear_params(A_w, B_w, A_bias)
    return compressed_linear_prepared(x, B_wT, A_wT, bias2d, n_out, tm=tm, tn=tn)


def _reference(x, B_w, A_w, A_bias):
    return (x @ B_w.T) @ A_w.T + A_bias[None, :]


if __name__ == "__main__":
    key = jax.random.PRNGKey(0)

    # --- Test 1: toy shapes from the module docstring (single block,
    #             out_features padded 16 -> 128 for lane-dense stores) ---
    batch, in_features, rank, out_features = 8, 32, 8, 16
    k_x, k_a, k_b, k_bias, key = jax.random.split(key, 5)
    x = jax.random.normal(k_x, (batch, in_features), dtype=jnp.float32)
    A_w = jax.random.normal(k_a, (out_features, rank), dtype=jnp.float32) * 0.1
    B_w = jax.random.normal(k_b, (rank, in_features), dtype=jnp.float32) * 0.1
    A_bias = jax.random.normal(k_bias, (out_features,), dtype=jnp.float32)

    y = jax.block_until_ready(compressed_linear(x, B_w, A_w, A_bias))
    y_ref = _reference(x, B_w, A_w, A_bias)
    assert y.shape == (batch, out_features)
    assert jnp.allclose(y, y_ref, atol=1e-4, rtol=1e-4), "mismatch (toy)"

    # --- Test 2: multi-block 2-D grid (M and N tiled), prepared-params path ---
    batch, in_features, rank, out_features = 384, 256, 16, 384
    k_x, k_a, k_b, k_bias, key = jax.random.split(key, 5)
    x = jax.random.normal(k_x, (batch, in_features), dtype=jnp.float32)
    A_w = jax.random.normal(k_a, (out_features, rank), dtype=jnp.float32) * 0.1
    B_w = jax.random.normal(k_b, (rank, in_features), dtype=jnp.float32) * 0.1
    A_bias = jax.random.normal(k_bias, (out_features,), dtype=jnp.float32)

    params = prepare_compressed_linear_params(A_w, B_w, A_bias)   # prep once
    y = jax.block_until_ready(
        compressed_linear_prepared(x, *params, tm=128, tn=128))
    y_ref = _reference(x, B_w, A_w, A_bias)
    assert y.shape == (batch, out_features)
    assert jnp.allclose(y, y_ref, atol=1e-3, rtol=1e-3), "mismatch (tiled 2D)"

    # --- Test 3: ragged batch + non-multiple-of-128 out_features (auto tiles) ---
    batch, out_features = 200, 200
    k_x, k_a, k_bias, key = jax.random.split(key, 4)
    x = jax.random.normal(k_x, (batch, in_features), dtype=jnp.float32)
    A_w = jax.random.normal(k_a, (out_features, rank), dtype=jnp.float32) * 0.1
    A_bias = jax.random.normal(k_bias, (out_features,), dtype=jnp.float32)
    y = jax.block_until_ready(compressed_linear(x, B_w, A_w, A_bias))
    y_ref = _reference(x, B_w, A_w, A_bias)
    assert y.shape == (batch, out_features)
    assert jnp.allclose(y, y_ref, atol=1e-3, rtol=1e-3), "mismatch (ragged)"

    print("KERNEL_OK")
</pallas_src>

<mosaic_0001>
module attributes {stable_mosaic.version = 11 : i64} {
  func.func @compressed_linear_kernel(%arg0: i32, %arg1: i32, %arg2: memref<8x32xf32, #tpu.memory_space<vmem>>, %arg3: memref<32x8xf32, #tpu.memory_space<vmem>>, %arg4: memref<8x128xf32, #tpu.memory_space<vmem>>, %arg5: memref<1x128xf32, #tpu.memory_space<vmem>>, %arg6: memref<8x128xf32, #tpu.memory_space<vmem>>) attributes {dimension_semantics = [#tpu.dimension_semantics<parallel>, #tpu.dimension_semantics<parallel>], iteration_bounds = array<i64: 1, 1>, scalar_prefetch = 0 : i64, scratch_operands = 0 : i64, tpu.core_type = #tpu.core_type<tc>, window_params = [{transform_indices = @transform_0, window_bounds = array<i64: 8, 32>}, {pipeline_mode = #tpu.pipeline_mode<synchronous>, transform_indices = @transform_1, window_bounds = array<i64: 32, 8>}, {pipeline_mode = #tpu.pipeline_mode<synchronous>, transform_indices = @transform_2, window_bounds = array<i64: 8, 128>}, {pipeline_mode = #tpu.pipeline_mode<synchronous>, transform_indices = @transform_3, window_bounds = array<i64: 1, 128>}, {transform_indices = @transform_4, window_bounds = array<i64: 8, 128>}]} {
    %c0 = arith.constant 0 : index
    %c0_0 = arith.constant 0 : index
    %0 = vector.load %arg2[%c0, %c0_0] : memref<8x32xf32, #tpu.memory_space<vmem>>, vector<8x32xf32>
    %c0_1 = arith.constant 0 : index
    %c0_2 = arith.constant 0 : index
    %1 = vector.load %arg3[%c0_1, %c0_2] : memref<32x8xf32, #tpu.memory_space<vmem>>, vector<32x8xf32>
    %cst = arith.constant dense<0.000000e+00> : vector<8x8xf32>
    %2 = tpu.matmul %0, %1, %cst {dimension_numbers = #tpu.dot_dimension_numbers<[1], [0], [0], [1], [0, 0, 1, 1], [], []>} : vector<8x32xf32>, vector<32x8xf32>, vector<8x8xf32> -> vector<8x8xf32>
    %c0_3 = arith.constant 0 : index
    %c0_4 = arith.constant 0 : index
    %3 = vector.load %arg4[%c0_3, %c0_4] : memref<8x128xf32, #tpu.memory_space<vmem>>, vector<8x128xf32>
    %cst_5 = arith.constant dense<0.000000e+00> : vector<8x128xf32>
    %4 = tpu.matmul %2, %3, %cst_5 {dimension_numbers = #tpu.dot_dimension_numbers<[1], [0], [0], [1], [0, 0, 1, 1], [], []>} : vector<8x8xf32>, vector<8x128xf32>, vector<8x128xf32> -> vector<8x128xf32>
    %c0_6 = arith.constant 0 : index
    %c0_7 = arith.constant 0 : index
    %5 = vector.load %arg5[%c0_6, %c0_7] : memref<1x128xf32, #tpu.memory_space<vmem>>, vector<1x128xf32>
    %6 = vector.broadcast %5 : vector<1x128xf32> to vector<8x128xf32>
    %7 = arith.addf %4, %6 : vector<8x128xf32>
    %c0_8 = arith.constant 0 : index
    %c0_9 = arith.constant 0 : index
    %8 = vector.load %arg6[%c0_8, %c0_9] : memref<8x128xf32, #tpu.memory_space<vmem>>, vector<8x128xf32>
    tpu.vector_store %arg6[%c0_8, %c0_9], %7 {strides = array<i32>} : memref<8x128xf32, #tpu.memory_space<vmem>>, vector<8x128xf32>,
    return
  }
  func.func @transform_0(%arg0: i32, %arg1: i32) -> (i32, i32) {
    %c0_i32 = arith.constant 0 : i32
    %c0_i32_0 = arith.constant 0 : i32
    return %arg0, %c0_i32 : i32, i32
  }
  func.func @transform_1(%arg0: i32, %arg1: i32) -> (i32, i32) {
    %c0_i32 = arith.constant 0 : i32
    %c0_i32_0 = arith.constant 0 : i32
    %c0_i32_1 = arith.constant 0 : i32
    return %c0_i32, %c0_i32_0 : i32, i32
  }
  func.func @transform_2(%arg0: i32, %arg1: i32) -> (i32, i32) {
    %c0_i32 = arith.constant 0 : i32
    %c0_i32_0 = arith.constant 0 : i32
    return %c0_i32, %arg1 : i32, i32
  }
  func.func @transform_3(%arg0: i32, %arg1: i32) -> (i32, i32) {
    %c0_i32 = arith.constant 0 : i32
    %c0_i32_0 = arith.constant 0 : i32
    return %c0_i32, %arg1 : i32, i32
  }
  func.func @transform_4(%arg0: i32, %arg1: i32) -> (i32, i32) {
    %c0_i32 = arith.constant 0 : i32
    return %arg0, %arg1 : i32, i32
  }
}

module attributes {stable_mosaic.version = 11 : i64} {
  func.func @compressed_linear_kernel(%arg0: i32, %arg1: i32, %arg2: memref<8x32xf32, #tpu.memory_space<vmem>>, %arg3: memref<32x8xf32, #tpu.memory_space<vmem>>, %arg4: memref<8x128xf32, #tpu.memory_space<vmem>>, %arg5: memref<1x128xf32, #tpu.memory_space<vmem>>, %arg6: memref<8x128xf32, #tpu.memory_space<vmem>>) attributes {dimension_semantics = [#tpu.dimension_semantics<parallel>, #tpu.dimension_semantics<parallel>], iteration_bounds = array<i64: 1, 1>, scalar_prefetch = 0 : i64, scratch_operands = 0 : i64, tpu.core_type = #tpu.core_type<tc>, window_params = [{transform_indices = @transform_0, window_bounds = array<i64: 8, 32>}, {pipeline_mode = #tpu.pipeline_mode<synchronous>, transform_indices = @transform_1, window_bounds = array<i64: 32, 8>}, {transform_indices = @transform_2, window_bounds = array<i64: 8, 128>}, {transform_indices = @transform_3, window_bounds = array<i64: 1, 128>}, {transform_indices = @transform_4, window_bounds = array<i64: 8, 128>}]} {
    %c0 = arith.constant 0 : index
    %c0_0 = arith.constant 0 : index
    %0 = vector.load %arg2[%c0, %c0_0] : memref<8x32xf32, #tpu.memory_space<vmem>>, vector<8x32xf32>
    %c0_1 = arith.constant 0 : index
    %c0_2 = arith.constant 0 : index
    %1 = vector.load %arg3[%c0_1, %c0_2] : memref<32x8xf32, #tpu.memory_space<vmem>>, vector<32x8xf32>
    %cst = arith.constant dense<0.000000e+00> : vector<8x8xf32>
    %2 = tpu.matmul %0, %1, %cst {dimension_numbers = #tpu.dot_dimension_numbers<[1], [0], [0], [1], [0, 0, 1, 1], [], []>} : vector<8x32xf32>, vector<32x8xf32>, vector<8x8xf32> -> vector<8x8xf32>
    %c0_3 = arith.constant 0 : index
    %c0_4 = arith.constant 0 : index
    %3 = vector.load %arg4[%c0_3, %c0_4] : memref<8x128xf32, #tpu.memory_space<vmem>>, vector<8x128xf32>
    %cst_5 = arith.constant dense<0.000000e+00> : vector<8x128xf32>
    %4 = tpu.matmul %2, %3, %cst_5 {dimension_numbers = #tpu.dot_dimension_numbers<[1], [0], [0], [1], [0, 0, 1, 1], [], []>} : vector<8x8xf32>, vector<8x128xf32>, vector<8x128xf32> -> vector<8x128xf32>
    %c0_6 = arith.constant 0 : index
    %c0_7 = arith.constant 0 : index
    %5 = vector.load %arg5[%c0_6, %c0_7] : memref<1x128xf32, #tpu.memory_space<vmem>>, vector<1x128xf32>
    %6 = vector.broadcast %5 : vector<1x128xf32> to vector<8x128xf32>
    %7 = arith.addf %4, %6 : vector<8x128xf32>
    %c0_8 = arith.constant 0 : index
    %c0_9 = arith.constant 0 : index
    %8 = vector.load %arg6[%c0_8, %c0_9] : memref<8x128xf32, #tpu.memory_space<vmem>>, vector<8x128xf32>
    tpu.vector_store %arg6[%c0_8, %c0_9], %7 {strides = array<i32>} : memref<8x128xf32, #tpu.memory_space<vmem>>, vector<8x128xf32>,
    return
  }
  func.func @transform_0(%arg0: i32, %arg1: i32) -> (i32, i32) {
    %c0_i32 = arith.constant 0 : i32
    %c0_i32_0 = arith.constant 0 : i32
    return %arg0, %c0_i32 : i32, i32
  }
  func.func @transform_1(%arg0: i32, %arg1: i32) -> (i32, i32) {
    %c0_i32 = arith.constant 0 : i32
    %c0_i32_0 = arith.constant 0 : i32
    %c0_i32_1 = arith.constant 0 : i32
    return %c0_i32, %c0_i32_0 : i32, i32
  }
  func.func @transform_2(%arg0: i32, %arg1: i32) -> (i32, i32) {
    %c0_i32 = arith.constant 0 : i32
    %c0_i32_0 = arith.constant 0 : i32
    return %c0_i32, %arg1 : i32, i32
  }
  func.func @transform_3(%arg0: i32, %arg1: i32) -> (i32, i32) {
    %c0_i32 = arith.constant 0 : i32
    %c0_i32_0 = arith.constant 0 : i32
    return %c0_i32, %arg1 : i32, i32
  }
  func.func @transform_4(%arg0: i32, %arg1: i32) -> (i32, i32) {
    %c0_i32 = arith.constant 0 : i32
    return %arg0, %arg1 : i32, i32
  }
}

</mosaic_0001>

<bundles_post_ra>
// kernel: tpu_custom_call.1
= control target key start
LH: loop header
LB: loop body
LE: loop exit
PB: predicated region body
PF: predicated region fallthrough
CT: control target
= control target key end

     0   :  { %v254_v3 = vmov 0.0|0.0   ;;  %vm255_vm0 = vmmov 0   ;;  %v256_v6 = vmov 0.0   ;;  %s316_s0 = inlined_call_operand.vmem [shape: f32[8,32], index: 0, kind: input, shape index: {}]   ;;  %s317_s1 = inlined_call_operand.vmem [shape: f32[32,8], index: 1, kind: input, shape index: {}]   ;;  %s318_s2 = inlined_call_operand.vmem [shape: f32[8,128], index: 2, kind: input, shape index: {}]   ;;  %s319_s3 = inlined_call_operand.vmem [shape: f32[1,128], index: 3, kind: input, shape index: {}]   ;;  %s320_s4 = inlined_call_operand.hbm [shape: f32[8,128], index: 4, kind: output, shape index: {}]  }
   0x1   :  { %v19_v0 = vld [vmem:[%s317_s1] sm:$0xff]  ;;  %v20_v1 = vld [vmem:[%s317_s1 + $0x8] sm:$0xff]  ;;  %v21_v2 = vld [vmem:[%s317_s1 + $0x10] sm:$0xff]  ;;  %220 = vmatprep.subr.bf16.mxu0 %v254_v3  ;;  %212 = vmatprep.mubr.msk.f32.mxu0 %vm255_vm0, %v256_v6 }
   0x2   :  { %v221_v4 = vpack.c.bf16 %v20_v1, %v19_v0  ;;  %v22_v5 = vld [vmem:[%s317_s1 + $0x18] sm:$0xff] }
   0x3   :  { %9 = vsyncpa [#allocation3], 0  ;;  %215 = vmatprep.subr.mxu1 %v256_v6  ;;  %217 = vmatprep.mubr.msk.f32.mxu1 %vm255_vm0, %v256_v6  ;;  %v224_v7 = vpack.c.bf16 %v22_v5, %v21_v2  ;;  %v18_v8 = vld [vmem:[%s316_s0] sm:$0xff]  ;;  %vm23_vm1 = vcmask 261120   ;;  %vm105_vm2 = vcmask 64512   ;;  %s257_s28 = smov [#allocation2]  }
   0x4   :  { %222 = vmatpush3.bf16.msra.mxu0 %v221_v4  ;;  %v97_v9 = vld [vmem:[%s318_s2] sm:$0xff]  ;;  %s186_s29 = sshll.u32 %s257_s28, 4  ;;  %s187_s29 = int_to_ptr.vmem [resolvable:$true] %s186_s29 }
   0x5   :  { %223 = vmatprep.subr.bf16.mxu0 %v254_v3  ;;  %216 = vmatpush3.msra.mxu1 %v97_v9  ;;  %v195_v12 = vld [vmem:[%s319_s3] ss:$0 sm:$0xff]  ;;  %s230_s0 = scalar_lea.vmem %s187_s29, 128  ;;  %p235_p1 = scmp.lt.s32.totalorder %s187_s29, %s187_s29 }
   0x6   :  { %p231_p0 = scmp.ne.s32.totalorder %s187_s29, %s230_s0  ;;  %p236_p2 = scmp.lt.s32.totalorder %s230_s0, %s230_s0 }
   0x8   :  { %225 = vmatpush3.bf16.msra.mxu0 %v224_v7  ;;  %p237_p3 = por %p236_p2, %p235_p1 }
   0xa   :  { %p238_p4 = pnand %p237_p3, %p231_p0 }
   0xb   :  { %213 = vmatmul.mubr.msk.f32.vlgmr.msra.gmra.mrb[0].mxu0 %vm23_vm1, %v18_v8 }
  0xde   :  { %v93_v10 = vpop.f32.mrb[0].mxu0 }
  0xdf   :  { %v214_v11 = vpop.f32.mrb[1].mxu0  ;;  %218 = vmatmul.mubr.msk.f32.vlgmr.msra.gmra.mrb[0].mxu1 %vm105_vm2, %v93_v10 }
 0x1b2   :  { %v175_v13 = vpop.f32.mrb[0].mxu1 }
 0x1b3   :  { %v176_v14 = vadd.f32 %v195_v12, %v175_v13  ;;  %v219_v15 = vpop.f32.mrb[1].mxu1 }
 0x1b5   :  { %179 = vst [vmem:[#allocation2] sm:$0xff] %v176_v14 }
 0x1b6   :  { %241 = shalt.err (!%p238_p4)
}
 0x1b7   :  { %s242_s5 = scalar_lea.hbm %s320_s4, 128 }
 0x1b8   :  { %p243_p5 = scmp.ne.s32.totalorder %s320_s4, %s242_s5  ;;  %p246_p6 = scmp.lt.u32.totalorder %s242_s5, %s320_s4 }
 0x1ba   :  { %p248_p7 = pnand %p246_p6, %p243_p5 }
 0x1bc   :  { %251 = shalt.err (!%p248_p7)
}
 0x1bd   :  { %189 = dma.vmem_to_hbm [thread:$0]  %s187_s29, 128, %s320_s4, [#allocation3]  }
 0x1be   :  { %252 = dma.done.wait [#allocation3], 128  }
 0x1bf   :  { %253 = vsyncadd [#allocation3], 4294967168 }
 0x1c0   :  { %193 = vsyncpa [#allocation3], 1 }

// kernel: tpu_custom_call.1
= control target key start
LH: loop header
LB: loop body
LE: loop exit
PB: predicated region body
PF: predicated region fallthrough
CT: control target
= control target key end

     0   :  { %v254_v3 = vmov 0.0|0.0   ;;  %vm255_vm0 = vmmov 0   ;;  %v256_v6 = vmov 0.0   ;;  %s316_s0 = inlined_call_operand.vmem [shape: f32[8,32], index: 0, kind: input, shape index: {}]   ;;  %s317_s1 = inlined_call_operand.vmem [shape: f32[32,8], index: 1, kind: input, shape index: {}]   ;;  %s318_s2 = inlined_call_operand.vmem [shape: f32[8,128], index: 2, kind: input, shape index: {}]   ;;  %s319_s3 = inlined_call_operand.vmem [shape: f32[1,128], index: 3, kind: input, shape index: {}]   ;;  %s320_s4 = inlined_call_operand.hbm [shape: f32[8,128], index: 4, kind: output, shape index: {}]  }
   0x1   :  { %v19_v0 = vld [vmem:[%s317_s1] sm:$0xff]  ;;  %v20_v1 = vld [vmem:[%s317_s1 + $0x8] sm:$0xff]  ;;  %v21_v2 = vld [vmem:[%s317_s1 + $0x10] sm:$0xff]  ;;  %220 = vmatprep.subr.bf16.mxu0 %v254_v3  ;;  %212 = vmatprep.mubr.msk.f32.mxu0 %vm255_vm0, %v256_v6 }
   0x2   :  { %v221_v4 = vpack.c.bf16 %v20_v1, %v19_v0  ;;  %v22_v5 = vld [vmem:[%s317_s1 + $0x18] sm:$0xff] }
   0x3   :  { %9 = vsyncpa [#allocation3], 0  ;;  %215 = vmatprep.subr.mxu1 %v256_v6  ;;  %217 = vmatprep.mubr.msk.f32.mxu1 %vm255_vm0, %v256_v6  ;;  %v224_v7 = vpack.c.bf16 %v22_v5, %v21_v2  ;;  %v18_v8 = vld [vmem:[%s316_s0] sm:$0xff]  ;;  %vm23_vm1 = vcmask 261120   ;;  %vm105_vm2 = vcmask 64512   ;;  %s257_s28 = smov [#allocation2]  }
   0x4   :  { %222 = vmatpush3.bf16.msra.mxu0 %v221_v4  ;;  %v97_v9 = vld [vmem:[%s318_s2] sm:$0xff]  ;;  %s186_s29 = sshll.u32 %s257_s28, 4  ;;  %s187_s29 = int_to_ptr.vmem [resolvable:$true] %s186_s29 }
   0x5   :  { %223 = vmatprep.subr.bf16.mxu0 %v254_v3  ;;  %216 = vmatpush3.msra.mxu1 %v97_v9  ;;  %v195_v12 = vld [vmem:[%s319_s3] ss:$0 sm:$0xff]  ;;  %s230_s0 = scalar_lea.vmem %s187_s29, 128  ;;  %p235_p1 = scmp.lt.s32.totalorder %s187_s29, %s187_s29 }
   0x6   :  { %p231_p0 = scmp.ne.s32.totalorder %s187_s29, %s230_s0  ;;  %p236_p2 = scmp.lt.s32.totalorder %s230_s0, %s230_s0 }
   0x8   :  { %225 = vmatpush3.bf16.msra.mxu0 %v224_v7  ;;  %p237_p3 = por %p236_p2, %p235_p1 }
   0xa   :  { %p238_p4 = pnand %p237_p3, %p231_p0 }
   0xb   :  { %213 = vmatmul.mubr.msk.f32.vlgmr.msra.gmra.mrb[0].mxu0 %vm23_vm1, %v18_v8 }
  0xde   :  { %v93_v10 = vpop.f32.mrb[0].mxu0 }
  0xdf   :  { %v214_v11 = vpop.f32.mrb[1].mxu0  ;;  %218 = vmatmul.mubr.msk.f32.vlgmr.msra.gmra.mrb[0].mxu1 %vm105_vm2, %v93_v10 }
 0x1b2   :  { %v175_v13 = vpop.f32.mrb[0].mxu1 }
 0x1b3   :  { %v176_v14 = vadd.f32 %v195_v12, %v175_v13  ;;  %v219_v15 = vpop.f32.mrb[1].mxu1 }
 0x1b5   :  { %179 = vst [vmem:[#allocation2] sm:$0xff] %v176_v14 }
 0x1b6   :  { %241 = shalt.err (!%p238_p4)
}
 0x1b7   :  { %s242_s5 = scalar_lea.hbm %s320_s4, 128 }
 0x1b8   :  { %p243_p5 = scmp.ne.s32.totalorder %s320_s4, %s242_s5  ;;  %p246_p6 = scmp.lt.u32.totalorder %s242_s5, %s320_s4 }
 0x1ba   :  { %p248_p7 = pnand %p246_p6, %p243_p5 }
 0x1bc   :  { %251 = shalt.err (!%p248_p7)
}
 0x1bd   :  { %189 = dma.vmem_to_hbm [thread:$0]  %s187_s29, 128, %s320_s4, [#allocation3]  }
 0x1be   :  { %252 = dma.done.wait [#allocation3], 128  }
 0x1bf   :  { %253 = vsyncadd [#allocation3], 4294967168 }
 0x1c0   :  { %193 = vsyncpa [#allocation3], 1 }

</bundles_post_ra>
